<compile_context>
chip_gen: v7x
topology: tpu7x:2x2x1
jax: 0.10.0
libtpu: 0.0.40
codegen_flags: <defaults>
</compile_context>

<pallas_src>
import functools

import jax
import jax.numpy as jnp
from jax.experimental import pallas as pl
from jax.experimental.pallas import tpu as pltpu

LANE = 128    # vreg lane width (last dim)
SUBLANE = 8   # vreg sublane width (second-to-last dim, f32)

_VMEM_BUDGET = 40 * 1024 * 1024   # working-set target (fits v7x 64 MiB w/ headroom)
_VMEM_LIMIT = 48 * 1024 * 1024    # explicit scoped-VMEM limit for the compiler


def _round_up(x: int, m: int) -> int:
    return ((x + m - 1) // m) * m


# --------------------------------------------------------------------------
# Kernels
# --------------------------------------------------------------------------
def _fused_kernel_full_k(x_ref, wt_ref, o_ref, *, negative_slope):
    """Whole (padded) K in one block: matmul + fused leaky-ReLU, no scratch."""
    v = jnp.dot(x_ref[...], wt_ref[...], preferred_element_type=jnp.float32)
    o_ref[...] = jnp.where(v > 0, v, v * negative_slope).astype(o_ref.dtype)


def _fused_kernel_split_k(x_ref, wt_ref, o_ref, acc_ref, *, negative_slope):
    """K-tiled path: f32 VMEM accumulator, fused leaky-ReLU epilogue."""
    k = pl.program_id(2)

    @pl.when(k == 0)
    def _init():
        acc_ref[...] = jnp.zeros_like(acc_ref)

    acc_ref[...] += jnp.dot(
        x_ref[...], wt_ref[...], preferred_element_type=jnp.float32
    )

    @pl.when(k == pl.num_programs(2) - 1)
    def _finalize():
        v = acc_ref[...]
        o_ref[...] = jnp.where(v > 0, v, v * negative_slope).astype(o_ref.dtype)


# --------------------------------------------------------------------------
# Tiling helpers
# --------------------------------------------------------------------------
def _pick_tile(dim_padded, max_tile, unit, prefer_multiple_blocks=False):
    """Pick a tile (multiple of `unit`, <= max_tile) minimizing round-up padding.

    Tie-break: prefer >=2 blocks when requested (v7x megacore), then larger tile.
    Returns (tile, padded_total).
    """
    hi = min(max_tile, dim_padded)
    cands = list(range(unit, hi + 1, unit)) or [unit]
    best = None
    for t in cands:
        total = _round_up(dim_padded, t)
        waste = total - dim_padded
        nblk = total // t
        multi_penalty = 0 if (not prefer_multiple_blocks or nblk >= 2) else 1
        key = (waste, multi_penalty, -t)
        if best is None or key < best[0]:
            best = (key, t, total)
    return best[1], best[2]


def _fits_vmem(tm, tk, tn, with_acc):
    """Approximate double-buffered working set (f32) against the budget."""
    b = 4
    total = 2 * tm * tk * b + 2 * tk * tn * b + 2 * tm * tn * b
    if with_acc:
        total += tm * tn * 4
    return total <= _VMEM_BUDGET


# --------------------------------------------------------------------------
# Wrapper
# --------------------------------------------------------------------------
def model_forward(x, weight, negative_slope=0.1, *, force_k_split=False,
                  max_k_tile=None):
    """x: (B, K) f32, weight: (N, K) f32 (PyTorch [out, in] convention)."""
    B, K = x.shape
    N, K_w = weight.shape
    assert K == K_w, "weight inner dim must match x feature dim"
    ns = float(negative_slope)
    out_dtype = x.dtype

    M8 = _round_up(B, SUBLANE)
    N128 = _round_up(N, LANE)
    K128 = _round_up(K, LANE)

    # --- tile selection (padding-aware) ---
    tm, M_pad = _pick_tile(M8, 512, SUBLANE)
    m_blocks = M_pad // tm
    tn, N_pad = _pick_tile(
        N128, 512, LANE, prefer_multiple_blocks=(m_blocks == 1)
    )
    n_blocks = N_pad // tn

    # Collapse the K grid axis when the full (padded) K fits the VMEM budget.
    k_split = force_k_split or not _fits_vmem(tm, K128, tn, with_acc=False)
    if not k_split:
        tk, K_pad = K128, K128
    else:
        hi = min(2048, K128)
        if max_k_tile is not None:
            hi = min(hi, max_k_tile)
        best = None
        for t in range(LANE, hi + 1, LANE):
            if not _fits_vmem(tm, t, tn, with_acc=True):
                continue
            total = _round_up(K128, t)
            key = (total - K128, -t)
            if best is None or key < best[0]:
                best = (key, t, total)
        if best is None:
            tk, K_pad = LANE, _round_up(K128, LANE)
        else:
            tk, K_pad = best[1], best[2]

    # Transpose the weight ONCE, outside the hot path: W^T is [K, N] so the
    # kernel contracts (tm,tk)x(tk,tn) with no per-step weight-tile transpose.
    wt = weight.T

    # Zero-pad to tile boundaries (exact for matmul; leaky-ReLU(0) == 0; the
    # padded rows/cols are sliced off below).
    x_p = x
    if (M_pad, K_pad) != (B, K):
        x_p = jnp.pad(x, ((0, M_pad - B), (0, K_pad - K)))
    wt_p = wt
    if (K_pad, N_pad) != (K, N):
        wt_p = jnp.pad(wt, ((0, K_pad - K), (0, N_pad - N)))

    if not k_split:
        out_padded = pl.pallas_call(
            functools.partial(_fused_kernel_full_k, negative_slope=ns),
            out_shape=jax.ShapeDtypeStruct((M_pad, N_pad), out_dtype),
            grid_spec=pltpu.PrefetchScalarGridSpec(
                num_scalar_prefetch=0,
                grid=(m_blocks, n_blocks),
                in_specs=[
                    # x block index constant across the inner N sweep: the
                    # activation tile stays resident, only W streams from HBM.
                    pl.BlockSpec((tm, K_pad), lambda i, j: (i, 0)),
                    pl.BlockSpec((K_pad, tn), lambda i, j: (0, j)),
                ],
                out_specs=pl.BlockSpec((tm, tn), lambda i, j: (i, j)),
            ),
            compiler_params=pltpu.CompilerParams(
                dimension_semantics=("parallel", "parallel"),
                vmem_limit_bytes=_VMEM_LIMIT,
            ),
        )(x_p, wt_p)
    else:
        out_padded = pl.pallas_call(
            functools.partial(_fused_kernel_split_k, negative_slope=ns),
            out_shape=jax.ShapeDtypeStruct((M_pad, N_pad), out_dtype),
            grid_spec=pltpu.PrefetchScalarGridSpec(
                num_scalar_prefetch=0,
                grid=(m_blocks, n_blocks, K_pad // tk),
                in_specs=[
                    pl.BlockSpec((tm, tk), lambda i, j, k: (i, k)),
                    pl.BlockSpec((tk, tn), lambda i, j, k: (k, j)),
                ],
                out_specs=pl.BlockSpec((tm, tn), lambda i, j, k: (i, j)),
                scratch_shapes=[pltpu.VMEM((tm, tn), jnp.float32)],
            ),
            compiler_params=pltpu.CompilerParams(
                dimension_semantics=("parallel", "parallel", "arbitrary"),
                vmem_limit_bytes=_VMEM_LIMIT,
            ),
        )(x_p, wt_p)

    return out_padded[:B, :N]


def _reference(x, weight, negative_slope):
    v1 = x @ weight.T
    return jnp.where(v1 > 0, v1, v1 * negative_slope)


if __name__ == "__main__":
    negative_slope = 0.1
    key = jax.random.PRNGKey(0)

    # --- Test 1: the module's own example (N=4, x1 = [[1, 2, 3, 4]]) ---
    N = 4
    wkey, key = jax.random.split(key)
    bound = 1.0 / (N ** 0.5)
    weight = jax.random.uniform(
        wkey, (N, N), dtype=jnp.float32, minval=-bound, maxval=bound
    )
    x1 = jnp.array([[1.0, 2.0, 3.0, 4.0]], dtype=jnp.float32)

    out = jax.block_until_ready(model_forward(x1, weight, negative_slope))
    ref = _reference(x1, weight, negative_slope)
    assert out.shape == (1, N)
    assert jnp.allclose(out, ref, atol=1e-5, rtol=1e-5)

    # --- Test 2: padding-aware tiles, multi-block N, collapsed K (N=K=640) ---
    N2, B2 = 640, 16
    wkey2, xkey2, key = jax.random.split(key, 3)
    bound2 = 1.0 / (N2 ** 0.5)
    weight2 = jax.random.uniform(
        wkey2, (N2, N2), dtype=jnp.float32, minval=-bound2, maxval=bound2
    )
    x2 = jax.random.normal(xkey2, (B2, N2), dtype=jnp.float32)

    out2 = jax.block_until_ready(model_forward(x2, weight2, negative_slope))
    ref2 = _reference(x2, weight2, negative_slope)
    assert out2.shape == (B2, N2)
    assert jnp.allclose(out2, ref2, atol=1e-4, rtol=1e-4)

    # --- Test 3: exercise the K-split accumulator path (forced small tk) ---
    N3, B3 = 384, 16
    wkey3, xkey3 = jax.random.split(key)
    bound3 = 1.0 / (N3 ** 0.5)
    weight3 = jax.random.uniform(
        wkey3, (N3, N3), dtype=jnp.float32, minval=-bound3, maxval=bound3
    )
    x3 = jax.random.normal(xkey3, (B3, N3), dtype=jnp.float32)

    out3 = jax.block_until_ready(
        model_forward(x3, weight3, negative_slope,
                      force_k_split=True, max_k_tile=128)
    )
    ref3 = _reference(x3, weight3, negative_slope)
    assert out3.shape == (B3, N3)
    assert jnp.allclose(out3, ref3, atol=1e-4, rtol=1e-4)

    print("KERNEL_OK")
</pallas_src>

<mosaic_0001>
module attributes {stable_mosaic.version = 11 : i64} {
  func.func @_fused_kernel_full_k(%arg0: i32, %arg1: i32, %arg2: memref<8x128xf32, #tpu.memory_space<vmem>>, %arg3: memref<128x128xf32, #tpu.memory_space<vmem>>, %arg4: memref<8x128xf32, #tpu.memory_space<vmem>>) attributes {dimension_semantics = [#tpu.dimension_semantics<parallel>, #tpu.dimension_semantics<parallel>], iteration_bounds = array<i64: 1, 1>, scalar_prefetch = 0 : i64, scratch_operands = 0 : i64, tpu.core_type = #tpu.core_type<tc>, window_params = [{transform_indices = @transform_0, window_bounds = array<i64: 8, 128>}, {transform_indices = @transform_1, window_bounds = array<i64: 128, 128>}, {transform_indices = @transform_2, window_bounds = array<i64: 8, 128>}]} {
    %c0 = arith.constant 0 : index
    %c0_0 = arith.constant 0 : index
    %0 = vector.load %arg2[%c0, %c0_0] : memref<8x128xf32, #tpu.memory_space<vmem>>, vector<8x128xf32>
    %c0_1 = arith.constant 0 : index
    %c0_2 = arith.constant 0 : index
    %1 = vector.load %arg3[%c0_1, %c0_2] : memref<128x128xf32, #tpu.memory_space<vmem>>, vector<128x128xf32>
    %cst = arith.constant dense<0.000000e+00> : vector<8x128xf32>
    %2 = tpu.matmul %0, %1, %cst {dimension_numbers = #tpu.dot_dimension_numbers<[1], [0], [0], [1], [0, 0, 1, 1], [], []>} : vector<8x128xf32>, vector<128x128xf32>, vector<8x128xf32> -> vector<8x128xf32>
    %cst_3 = arith.constant 0.000000e+00 : f32
    %3 = vector.broadcast %cst_3 : f32 to vector<8x128xf32>
    %4 = arith.cmpf ogt, %2, %3 : vector<8x128xf32>
    %cst_4 = arith.constant 1.000000e-01 : f32
    %5 = vector.broadcast %cst_4 : f32 to vector<8x128xf32>
    %6 = arith.mulf %2, %5 : vector<8x128xf32>
    %7 = arith.select %4, %2, %6 : vector<8x128xi1>, vector<8x128xf32>
    %c0_5 = arith.constant 0 : index
    %c0_6 = arith.constant 0 : index
    %8 = vector.load %arg4[%c0_5, %c0_6] : memref<8x128xf32, #tpu.memory_space<vmem>>, vector<8x128xf32>
    tpu.vector_store %arg4[%c0_5, %c0_6], %7 {strides = array<i32>} : memref<8x128xf32, #tpu.memory_space<vmem>>, vector<8x128xf32>,
    return
  }
  func.func @transform_0(%arg0: i32, %arg1: i32) -> (i32, i32) {
    %c0_i32 = arith.constant 0 : i32
    %c0_i32_0 = arith.constant 0 : i32
    return %arg0, %c0_i32 : i32, i32
  }
  func.func @transform_1(%arg0: i32, %arg1: i32) -> (i32, i32) {
    %c0_i32 = arith.constant 0 : i32
    %c0_i32_0 = arith.constant 0 : i32
    return %c0_i32, %arg1 : i32, i32
  }
  func.func @transform_2(%arg0: i32, %arg1: i32) -> (i32, i32) {
    %c0_i32 = arith.constant 0 : i32
    return %arg0, %arg1 : i32, i32
  }
}

</mosaic_0001>

<bundles_post_ra>
// kernel: tpu_custom_call.1
= control target key start
LH: loop header
LB: loop body
LE: loop exit
PB: predicated region body
PF: predicated region fallthrough
CT: control target
= control target key end

     0   :  { %7 = vsyncpa [#allocation3], 0  ;;  %s367_s0 = inlined_call_operand.hbm [shape: f32[8,128], index: 0, kind: input, shape index: {}]   ;;  %s368_s1 = inlined_call_operand.hbm [shape: f32[128,128], index: 1, kind: input, shape index: {}]   ;;  %s369_s2 = inlined_call_operand.hbm [shape: f32[8,128], index: 2, kind: output, shape index: {}]  }
   0x1   :  { %8 = vsyncpa [#allocation6], 0 }
   0x2   :  { %9 = vsyncpa [#allocation4], 0  ;;  %s301_s9 = smov [#allocation2]   ;;  %s302_s11 = smov [#allocation5]  }
   0x3   :  { %s16_s10 = sshll.u32 %s301_s9, 4  ;;  %s25_s12 = sshll.u32 %s302_s11, 4  ;;  %s17_s10 = int_to_ptr.vmem [resolvable:$true] %s16_s10  ;;  %s324_s12 = int_to_ptr.vmem [resolvable:$true] %s25_s12 }
   0x4   :  { %s229_s15 = scalar_lea.hbm %s367_s0, 128 }
   0x5   :  { %p230_p0 = scmp.ne.s32.totalorder %s367_s0, %s229_s15  ;;  %p233_p1 = scmp.lt.u32.totalorder %s229_s15, %s367_s0 }
   0x7   :  { %p235_p2 = pnand %p233_p1, %p230_p0 }
   0x9   :  { %238 = shalt.err (!%p235_p2)
}
   0xa   :  { %s239_s20 = scalar_lea.vmem %s17_s10, 128  ;;  %p244_p4 = scmp.lt.s32.totalorder %s17_s10, %s17_s10 }
   0xb   :  { %p240_p3 = scmp.ne.s32.totalorder %s17_s10, %s239_s20  ;;  %p245_p5 = scmp.lt.s32.totalorder %s239_s20, %s239_s20 }
   0xd   :  { %p246_p6 = por %p245_p5, %p244_p4 }
   0xf   :  { %p247_p7 = pnand %p246_p6, %p240_p3 }
  0x11   :  { %250 = shalt.err (!%p247_p7)
}
  0x12   :  { %19 = dma.hbm_to_vmem [thread:$0]  %s367_s0, 128, %s17_s10, [#allocation3]  }
  0x13   :  { %s251_s25 = scalar_lea.hbm %s368_s1, 2048 }
  0x14   :  { %p252_p8 = scmp.ne.s32.totalorder %s368_s1, %s251_s25  ;;  %p255_p9 = scmp.lt.u32.totalorder %s251_s25, %s368_s1 }
  0x16   :  { %p257_p10 = pnand %p255_p9, %p252_p8 }
  0x18   :  { %260 = shalt.err (!%p257_p10)
}
  0x19   :  { %s261_s30 = scalar_lea.vmem %s324_s12, 2048  ;;  %p266_p12 = scmp.lt.s32.totalorder %s324_s12, %s324_s12 }
  0x1a   :  { %p262_p11 = scmp.ne.s32.totalorder %s324_s12, %s261_s30  ;;  %p267_p13 = scmp.lt.s32.totalorder %s261_s30, %s261_s30 }
  0x1c   :  { %p268_p0 = por %p267_p13, %p266_p12 }
  0x1e   :  { %p269_p1 = pnand %p268_p0, %p262_p11 }
  0x20   :  { %272 = shalt.err (!%p269_p1)
}
  0x21   :  { %s303_s0 = smov 128   ;;  %s304_s3 = smov 8  }
  0x22   :  { %31 = dma.hbm_to_vmem [thread:$0]  %s368_s1, 2048, %s324_s12, [#allocation6], %s303_s0, %s303_s0, %s304_s3  }
  0x23   :  { %295 = dma.done.wait [#allocation3], 128  }
  0x24   :  { %296 = vsyncadd [#allocation3], 4294967168 }
  0x25   :  { %297 = dma.done.wait [#allocation6], 2048  }
  0x26   :  { %298 = vsyncadd [#allocation6], 4294965248  ;;  %v305_v0 = vmov 0.0|0.0   ;;  %vm306_vm0 = vmmov 0   ;;  %v307_v1 = vmov 0.0   ;;  %v39_v2 = vld [vmem:[#allocation5] sm:$0xff] }
  0x27   :  { %197 = vmatprep.subr.bf16.mxu0 %v305_v0  ;;  %194 = vmatprep.mubr.msk.f32.mxu0 %vm306_vm0, %v307_v1  ;;  %v40_v3 = vld [vmem:[#allocation5 + $0x8] sm:$0xff]  ;;  %v41_v4 = vld [vmem:[#allocation5 + $0x10] sm:$0xff]  ;;  %v42_v6 = vld [vmem:[#allocation5 + $0x18] sm:$0xff]  ;;  %s308_s1 = smov [#allocation7]  }
  0x28   :  { %v198_v5 = vpack.c.bf16 %v40_v3, %v39_v2  ;;  %v201_v7 = vpack.c.bf16 %v42_v6, %v41_v4  ;;  %v43_v8 = vld [vmem:[#allocation5 + $0x20] sm:$0xff]  ;;  %v44_v9 = vld [vmem:[#allocation5 + $0x28] sm:$0xff]  ;;  %v45_v11 = vld [vmem:[#allocation5 + $0x30] sm:$0xff]  ;;  %s135_s6 = sshll.u32 %s308_s1, 4  ;;  %s136_s6 = int_to_ptr.vmem [resolvable:$true] %s135_s6 }
  0x29   :  { %v204_v10 = vpack.c.bf16 %v44_v9, %v43_v8  ;;  %v46_v12 = vld [vmem:[#allocation5 + $0x38] sm:$0xff]  ;;  %v47_v14 = vld [vmem:[#allocation5 + $0x40] sm:$0xff]  ;;  %v48_v15 = vld [vmem:[#allocation5 + $0x48] sm:$0xff]  ;;  %s273_s7 = scalar_lea.vmem %s136_s6, 128  ;;  %p278_p3 = scmp.lt.s32.totalorder %s136_s6, %s136_s6 }
  0x2a   :  { %199 = vmatpush3.bf16.msra.mxu0 %v198_v5  ;;  %v207_v13 = vpack.c.bf16 %v46_v12, %v45_v11  ;;  %v210_v16 = vpack.c.bf16 %v48_v15, %v47_v14  ;;  %v49_v17 = vld [vmem:[#allocation5 + $0x50] sm:$0xff]  ;;  %v50_v18 = vld [vmem:[#allocation5 + $0x58] sm:$0xff]  ;;  %v51_v20 = vld [vmem:[#allocation5 + $0x60] sm:$0xff]  ;;  %p274_p2 = scmp.ne.s32.totalorder %s136_s6, %s273_s7  ;;  %p279_p4 = scmp.lt.s32.totalorder %s273_s7, %s273_s7 }
  0x2b   :  { %200 = vmatprep.subr.bf16.mxu0 %v305_v0  ;;  %v213_v19 = vpack.c.bf16 %v50_v18, %v49_v17  ;;  %v52_v21 = vld [vmem:[#allocation5 + $0x68] sm:$0xff]  ;;  %v53_v23 = vld [vmem:[#allocation5 + $0x70] sm:$0xff]  ;;  %v54_v24 = vld [vmem:[#allocation5 + $0x78] sm:$0xff] }
  0x2c   :  { %v216_v22 = vpack.c.bf16 %v52_v21, %v51_v20  ;;  %v219_v25 = vpack.c.bf16 %v54_v24, %v53_v23  ;;  %v38_v26 = vld [vmem:[#allocation2] sm:$0xff]  ;;  %p280_p5 = por %p279_p4, %p278_p3 }
  0x2e   :  { %202 = vmatpush3.bf16.msra.mxu0 %v201_v7  ;;  %p281_p6 = pnand %p280_p5, %p274_p2 }
  0x2f   :  { %203 = vmatprep.subr.bf16.mxu0 %v305_v0 }
  0x32   :  { %205 = vmatpush3.bf16.msra.mxu0 %v204_v10 }
  0x33   :  { %206 = vmatprep.subr.bf16.mxu0 %v305_v0 }
  0x36   :  { %208 = vmatpush3.bf16.msra.mxu0 %v207_v13 }
  0x37   :  { %209 = vmatprep.subr.bf16.mxu0 %v305_v0 }
  0x3a   :  { %211 = vmatpush3.bf16.msra.mxu0 %v210_v16 }
  0x3b   :  { %212 = vmatprep.subr.bf16.mxu0 %v305_v0 }
  0x3e   :  { %214 = vmatpush3.bf16.msra.mxu0 %v213_v19 }
  0x3f   :  { %215 = vmatprep.subr.bf16.mxu0 %v305_v0 }
  0x42   :  { %217 = vmatpush3.bf16.msra.mxu0 %v216_v22 }
  0x43   :  { %218 = vmatprep.subr.bf16.mxu0 %v305_v0 }
  0x46   :  { %220 = vmatpush3.bf16.msra.mxu0 %v219_v25 }
  0x49   :  { %195 = vmatmul.mubr.f32.vlgmr.msra.gmra.mrb[0].mxu0 %v38_v26 }
 0x11c   :  { %v121_v27 = vpop.f32.mrb[0].mxu0 }
 0x11d   :  { %vm125_vm1 = vcmp.gt.f32.partialorder %v121_v27, 0.0  ;;  %v126_v28 = vmul.f32 0.1, %v121_v27  ;;  %v196_v29 = vpop.f32.mrb[1].mxu0 }
 0x11f   :  { %v127_v30 = vsel %vm125_vm1, %v121_v27, %v126_v28 }
 0x120   :  { %128 = vst [vmem:[#allocation7] sm:$0xff] %v127_v30 }
 0x121   :  { %284 = shalt.err (!%p281_p6)
}
 0x122   :  { %s285_s10 = scalar_lea.hbm %s369_s2, 128 }
 0x123   :  { %p286_p7 = scmp.ne.s32.totalorder %s369_s2, %s285_s10  ;;  %p289_p8 = scmp.lt.u32.totalorder %s285_s10, %s369_s2 }
 0x125   :  { %p291_p9 = pnand %p289_p8, %p286_p7 }
 0x127   :  { %294 = shalt.err (!%p291_p9)
}
 0x128   :  { %138 = dma.vmem_to_hbm [thread:$0]  %s136_s6, 128, %s369_s2, [#allocation4]  }
 0x129   :  { %299 = dma.done.wait [#allocation4], 128  }
 0x12a   :  { %300 = vsyncadd [#allocation4], 4294967168 }
 0x12b   :  { %142 = vsyncpa [#allocation3], 1 }
 0x12c   :  { %143 = vsyncpa [#allocation6], 1 }
 0x12d   :  { %144 = vsyncpa [#allocation4], 1 }

</bundles_post_ra>
